<compile_context>
chip_gen: v5e
topology: v5e:2x2
jax: 0.10.0
libtpu: 0.0.40
codegen_flags: <defaults>
</compile_context>

<pallas_src>
import jax
import jax.numpy as jnp
from jax.experimental import pallas as pl
from jax.experimental.pallas import tpu as pltpu


# -----------------------------------------------------------------------------
# Module forward: identity on the parameter.  No pallas_call, no reshape pair,
# no input/output aliasing of a live parameter buffer.
# -----------------------------------------------------------------------------
def scalar_forward(constant: jax.Array) -> jax.Array:
    """Forward pass of `Scalar`: returns the 0-D float32 parameter as-is."""
    return constant


# -----------------------------------------------------------------------------
# Demonstration consumer kernel (how a downstream Pallas kernel should ingest
# the scalar): the parameter rides the scalar path (SMEM) and is applied on
# the VPU inside the consumer's body — no standalone launch for the scalar.
# -----------------------------------------------------------------------------
def _consume_scalar_kernel(c_ref, x_ref, o_ref):
    # c_ref: (1,) float32 in SMEM (scalar path, costs zero vector slots).
    # x_ref/o_ref: full-array VMEM tiles.
    o_ref[...] = x_ref[...] * c_ref[0]


def scaled_by_parameter(constant: jax.Array, x: jax.Array) -> jax.Array:
    """Example consumer: y = constant * x, with the scalar folded in via SMEM."""
    c1 = constant.reshape(1)  # (1,) for 1-D SMEM (no 2-D tile padding)
    return pl.pallas_call(
        _consume_scalar_kernel,
        out_shape=jax.ShapeDtypeStruct(x.shape, x.dtype),
        in_specs=[
            pl.BlockSpec(memory_space=pltpu.MemorySpace.SMEM),  # the scalar
            pl.BlockSpec(memory_space=pltpu.MemorySpace.VMEM),  # the tensor
        ],
        out_specs=pl.BlockSpec(memory_space=pltpu.MemorySpace.VMEM),
    )(c1, x)


if __name__ == "__main__":
    # Deterministic parameter initialization (module __init__ takes init_value).
    key = jax.random.PRNGKey(0)
    k_init, k_x = jax.random.split(key)
    init_value = float(jax.random.uniform(k_init, (), jnp.float32))
    constant_param = jnp.asarray(init_value, dtype=jnp.float32)  # the nn.Parameter

    # --- Module forward: pure identity (the optimal implementation). ---------
    result = scalar_forward(constant_param)
    jax.block_until_ready(result)
    assert result.shape == ()
    assert result.dtype == jnp.float32
    assert jnp.allclose(result, jnp.float32(init_value))

    # --- Demonstration: scalar folded into a consuming Pallas kernel. --------
    x = jax.random.normal(k_x, (8, 128), dtype=jnp.float32)
    y = scaled_by_parameter(constant_param, x)
    jax.block_until_ready(y)
    assert y.shape == x.shape
    assert jnp.allclose(y, x * init_value, rtol=1e-6, atol=1e-6)

    print("KERNEL_OK")
</pallas_src>

<mosaic_0001>
module attributes {stable_mosaic.version = 11 : i64} {
  func.func @_consume_scalar_kernel(%arg0: memref<1xf32, #tpu.memory_space<smem>>, %arg1: memref<8x128xf32, #tpu.memory_space<vmem>>, %arg2: memref<8x128xf32, #tpu.memory_space<vmem>>) attributes {dimension_semantics = [], scalar_prefetch = 0 : i64, scratch_operands = 0 : i64, tpu.core_type = #tpu.core_type<tc>} {
    %c0 = arith.constant 0 : index
    %c0_0 = arith.constant 0 : index
    %0 = vector.load %arg1[%c0, %c0_0] : memref<8x128xf32, #tpu.memory_space<vmem>>, vector<8x128xf32>
    %c0_1 = arith.constant 0 : index
    %1 = memref.load %arg0[%c0_1] : memref<1xf32, #tpu.memory_space<smem>>
    %2 = vector.broadcast %1 : f32 to vector<8x128xf32>
    %3 = arith.mulf %0, %2 : vector<8x128xf32>
    %c0_2 = arith.constant 0 : index
    %c0_3 = arith.constant 0 : index
    %4 = vector.load %arg2[%c0_2, %c0_3] : memref<8x128xf32, #tpu.memory_space<vmem>>, vector<8x128xf32>
    tpu.vector_store %arg2[%c0_2, %c0_3], %3 {strides = array<i32>} : memref<8x128xf32, #tpu.memory_space<vmem>>, vector<8x128xf32>,
    return
  }
}

</mosaic_0001>

<bundles_post_ra>
// kernel: tpu_custom_call.1
= control target key start
LH: loop header
LB: loop body
LE: loop exit
PB: predicated region body
PF: predicated region fallthrough
CT: control target
= control target key end

     0   :  { %8 = vsyncpa [#allocation4], 0  ;;  %s129_s0 = inlined_call_operand.<no memory space> [shape: f32[1], index: 0, kind: input, shape index: {}]   ;;  %s130_s1 = inlined_call_operand.hbm [shape: f32[8,128], index: 1, kind: input, shape index: {}]   ;;  %s131_s2 = inlined_call_operand.hbm [shape: f32[8,128], index: 2, kind: output, shape index: {}]  }
   0x1   :  { %9 = vsyncpa [#allocation5], 0  ;;  %s17_s11 = sshll.u32 %s130_s1, 4  ;;  %s103_s12 = smov [#allocation3]   ;;  %s18_s11 = int_to_ptr.hbm [resolvable:$true] %s17_s11 }
   0x2   :  { %s19_s13 = sshll.u32 %s103_s12, 4  ;;  %s20_s13 = int_to_ptr.vmem [resolvable:$true] %s19_s13 }
   0x3   :  { %22 = dma.hbm_to_vmem [thread:$0]  %s18_s11, 128, %s20_s13, [#allocation4]  }
   0x4   :  { %99 = dma.done.wait [#allocation4], 128  }
   0x5   :  { %100 = vsyncadd [#allocation4], 4294967168  ;;  %v29_v0 = vstv %s129_s0  ;;  %s104_s16 = smov [#allocation6]   ;;  %s39_s20 = sshll.u32 %s131_s2, 4  ;;  %v27_v1 = vld [vmem:[#allocation3] sm:$0xff]  ;;  %s40_s20 = int_to_ptr.hbm [resolvable:$true] %s39_s20 }
   0x6   :  { %s37_s17 = sshll.u32 %s104_s16, 4  ;;  %v30_v2 = vmul.f32 %v29_v0, %v27_v1  ;;  %s38_s17 = int_to_ptr.vmem [resolvable:$true] %s37_s17 }
   0x8   :  { %31 = vst [vmem:[#allocation6] sm:$0xff] %v30_v2 }
   0x9   :  { %42 = dma.vmem_to_hbm [thread:$0]  %s38_s17, 128, %s40_s20, [#allocation5]  }
   0xa   :  { %101 = dma.done.wait [#allocation5], 128  }
   0xb   :  { %102 = vsyncadd [#allocation5], 4294967168 }
   0xc   :  { %47 = vsyncpa [#allocation4], 1 }
   0xd   :  { %48 = vsyncpa [#allocation5], 1 }

</bundles_post_ra>
